<compile_context>
chip_gen: v7x
topology: tpu7x:2x2x1
jax: 0.10.0
libtpu: 0.0.40
codegen_flags: <defaults>
</compile_context>

<pallas_src>
import functools

import jax
import jax.numpy as jnp
from jax.experimental import pallas as pl
from jax.experimental.pallas import tpu as pltpu

EPS = 1e-5


def _round_up(x, m):
    return (x + m - 1) // m * m


# ---------------- kernel 1: fc1 + BN1 (precomputed scale/shift) + ReLU + fc2 + BN2 stat partials ----
def _fused_fc1_bn1_relu_fc2_kernel(x_ref, w1_ref, w2_ref, sc1_ref, sh1_ref,
                                   a2_ref, sum2_ref, sq2_ref,
                                   *, need_mask, last_valid):
    # fc1 (bias dropped: a per-feature constant cancels under training-mode BN mean subtraction).
    a1 = jnp.dot(x_ref[...].astype(jnp.bfloat16), w1_ref[...],
                 preferred_element_type=jnp.float32)                      # (tb, 512) f32
    # BN1 (full-batch analytic scale/shift) + ReLU, FMA-friendly.
    h1 = jnp.maximum(a1 * sc1_ref[...] + sh1_ref[...], 0.0)
    # fc2 (bias dropped).
    a2 = jnp.dot(h1.astype(jnp.bfloat16), w2_ref[...],
                 preferred_element_type=jnp.float32)                      # (tb, 256) f32

    a2_ref[...] = a2.astype(a2_ref.dtype)                                 # bf16 writeback
    # Per-tile BN2 statistics in f32 (from the f32 accumulator, before the bf16 cast).
    sum2_ref[...] = jnp.sum(a2, axis=0, keepdims=True)[None]              # (1, 1, 256)
    sq2_ref[...] = jnp.sum(a2 * a2, axis=0, keepdims=True)[None]

    if need_mask:
        # Only the last tile contains padded (undefined) batch rows: redo its stats masked.
        @pl.when(pl.program_id(0) == pl.num_programs(0) - 1)
        def _():
            rows = jax.lax.broadcasted_iota(jnp.int32, a2.shape, 0)
            a2m = jnp.where(rows < last_valid, a2, 0.0)
            sum2_ref[...] = jnp.sum(a2m, axis=0, keepdims=True)[None]
            sq2_ref[...] = jnp.sum(a2m * a2m, axis=0, keepdims=True)[None]


# ---------------- kernel 2: BN2 (precomputed scale/shift) + ReLU + boxreg head ----------------
def _bn2_relu_head_kernel(a2_ref, w3_ref, b3_ref, sc2_ref, sh2_ref, out_ref):
    h2 = jnp.maximum(a2_ref[...].astype(jnp.float32) * sc2_ref[...] + sh2_ref[...], 0.0)
    out_ref[...] = jnp.dot(h2.astype(jnp.bfloat16), w3_ref[...],
                           preferred_element_type=jnp.float32) + b3_ref[...]   # (tb, 8) f32


def bbreg_net(x, params, *, tile_b=2048):
    """Forward pass of BBregNet with training-mode BatchNorm semantics.

    x: (B, in_dim) float32. params: dict from init_params (weights stored transposed, (in, out)).
    """
    f32, bf16 = jnp.float32, jnp.bfloat16
    B, in_dim = x.shape
    H1 = params["w1"].shape[1]          # 512
    H2 = params["w2"].shape[1]          # 256
    OUT = params["w3"].shape[1]         # 4
    OUT_P = _round_up(OUT, 8)           # 4 -> 8 (block last dim == full array dim -> legal)

    # Batch tiling: rows multiple of 8, and at least 2 tiles when B allows it (v7x megacore).
    half = _round_up((B + 1) // 2, 8)
    tb = max(8, min(_round_up(tile_b, 8), half))
    b_pad = _round_up(B, tb)
    n_t = b_pad // tb
    need_mask = b_pad != B
    last_valid = B - (n_t - 1) * tb
    inv_b = 1.0 / float(B)

    hi = jax.lax.Precision.HIGHEST

    # ---- analytic full-batch BN1 statistics (a1 = x @ W1 is linear in x); tiny f32 pre-pass ----
    w1f = params["w1"]
    xs = jnp.sum(x, axis=0, keepdims=True)                                  # (1, in_dim)
    xtx = jnp.matmul(x.T, x, precision=hi)                                  # (in_dim, in_dim)
    sum1 = jnp.matmul(xs, w1f, precision=hi)                                # (1, H1)
    ssq1 = jnp.sum(w1f * jnp.matmul(xtx, w1f, precision=hi), axis=0, keepdims=True)
    mean1 = sum1 * inv_b
    var1 = jnp.maximum(ssq1 * inv_b - mean1 * mean1, 0.0)                   # biased batch variance
    scale1 = params["g1"] * jax.lax.rsqrt(var1 + EPS)
    shift1 = params["be1"] - mean1 * scale1

    # Weights (bf16 MXU operands); head padded to 8 output lanes.
    w1 = w1f.astype(bf16)
    w2 = params["w2"].astype(bf16)
    w3 = jnp.zeros((H2, OUT_P), f32).at[:, :OUT].set(params["w3"]).astype(bf16)
    b3 = jnp.zeros((1, OUT_P), f32).at[:, :OUT].set(params["b3"])
    # NOTE: params["b1"] / params["b2"] are intentionally unused (they cancel under training-mode BN).

    cparams = pltpu.CompilerParams(dimension_semantics=("parallel",),
                                   vmem_limit_bytes=48 * 1024 * 1024)

    # ---------------- kernel 1 ----------------
    a2, s2, q2 = pl.pallas_call(
        functools.partial(_fused_fc1_bn1_relu_fc2_kernel,
                          need_mask=need_mask, last_valid=last_valid),
        out_shape=(jax.ShapeDtypeStruct((b_pad, H2), bf16),
                   jax.ShapeDtypeStruct((n_t, 1, H2), f32),
                   jax.ShapeDtypeStruct((n_t, 1, H2), f32)),
        grid_spec=pltpu.PrefetchScalarGridSpec(
            num_scalar_prefetch=0, grid=(n_t,),
            in_specs=[pl.BlockSpec((tb, in_dim), lambda i: (i, 0)),
                      pl.BlockSpec((in_dim, H1), lambda i: (0, 0)),
                      pl.BlockSpec((H1, H2), lambda i: (0, 0)),
                      pl.BlockSpec((1, H1), lambda i: (0, 0)),
                      pl.BlockSpec((1, H1), lambda i: (0, 0))],
            out_specs=(pl.BlockSpec((tb, H2), lambda i: (i, 0)),
                       pl.BlockSpec((1, 1, H2), lambda i: (i, 0, 0)),
                       pl.BlockSpec((1, 1, H2), lambda i: (i, 0, 0)))),
        compiler_params=cparams,
    )(x, w1, w2, scale1, shift1)

    # Cross-tile reduce of BN2 stats + fused scale/shift (tiny glue ops).
    sum2 = jnp.sum(s2, axis=0)                                              # (1, H2)
    ssq2 = jnp.sum(q2, axis=0)
    mean2 = sum2 * inv_b
    var2 = jnp.maximum(ssq2 * inv_b - mean2 * mean2, 0.0)
    scale2 = params["g2"] * jax.lax.rsqrt(var2 + EPS)
    shift2 = params["be2"] - mean2 * scale2

    # ---------------- kernel 2 ----------------
    out_pad = pl.pallas_call(
        _bn2_relu_head_kernel,
        out_shape=jax.ShapeDtypeStruct((b_pad, OUT_P), f32),
        grid_spec=pltpu.PrefetchScalarGridSpec(
            num_scalar_prefetch=0, grid=(n_t,),
            in_specs=[pl.BlockSpec((tb, H2), lambda i: (i, 0)),
                      pl.BlockSpec((H2, OUT_P), lambda i: (0, 0)),
                      pl.BlockSpec((1, OUT_P), lambda i: (0, 0)),
                      pl.BlockSpec((1, H2), lambda i: (0, 0)),
                      pl.BlockSpec((1, H2), lambda i: (0, 0))],
            out_specs=pl.BlockSpec((tb, OUT_P), lambda i: (i, 0))),
        compiler_params=cparams,
    )(a2, w3, b3, scale2, shift2)

    return out_pad[:B, :OUT]


def bbreg_reference(x, params):
    """Pure-JAX f32 reference matching the PyTorch module (training-mode BN, biases kept)."""
    def bn(h, g, be):
        m = jnp.mean(h, axis=0, keepdims=True)
        v = jnp.mean((h - m) ** 2, axis=0, keepdims=True)
        return (h - m) * jax.lax.rsqrt(v + EPS) * g + be
    h1 = jnp.maximum(bn(x @ params["w1"] + params["b1"], params["g1"], params["be1"]), 0.0)
    h2 = jnp.maximum(bn(h1 @ params["w2"] + params["b2"], params["g2"], params["be2"]), 0.0)
    return h2 @ params["w3"] + params["b3"]


def init_params(key, in_dim=64):
    """Deterministic synthetic parameters matching BBregNet's shapes (weights stored (in, out))."""
    ks = jax.random.split(key, 8)
    f32 = jnp.float32

    def lin(kw, kb, fan_in, fan_out):
        w = jax.random.normal(kw, (fan_in, fan_out), dtype=f32) * 0.02
        b = jax.random.normal(kb, (1, fan_out), dtype=f32) * 0.01
        return w, b

    w1, b1 = lin(ks[0], ks[1], in_dim, 512)
    w2, b2 = lin(ks[2], ks[3], 512, 256)
    w3, b3 = lin(ks[4], ks[5], 256, 4)
    g1 = 1.0 + 0.1 * jax.random.normal(ks[6], (1, 512), dtype=f32)
    be1 = jnp.zeros((1, 512), dtype=f32)
    g2 = 1.0 + 0.1 * jax.random.normal(ks[7], (1, 256), dtype=f32)
    be2 = jnp.zeros((1, 256), dtype=f32)
    return dict(w1=w1, b1=b1, g1=g1, be1=be1,
                w2=w2, b2=b2, g2=g2, be2=be2,
                w3=w3, b3=b3)


if __name__ == "__main__":
    key = jax.random.PRNGKey(0)
    k_x, k_p = jax.random.split(key)

    B, in_dim = 8, 64
    x = jax.random.normal(k_x, (B, in_dim), dtype=jnp.float32)
    params = init_params(k_p, in_dim=in_dim)

    fwd = jax.jit(bbreg_net)
    out = fwd(x, params)
    jax.block_until_ready(out)
    assert out.shape == (B, 4) and out.dtype == jnp.float32

    ref = bbreg_reference(x, params)
    assert bool(jnp.allclose(out, ref, rtol=5e-2, atol=5e-2)), "mismatch vs f32 reference"

    print("KERNEL_OK")
</pallas_src>

<mosaic_0001>
module attributes {stable_mosaic.version = 11 : i64} {
  func.func @_fused_fc1_bn1_relu_fc2_kernel(%arg0: i32, %arg1: memref<8x64xf32, #tpu.memory_space<vmem>>, %arg2: memref<64x512xbf16, #tpu.memory_space<vmem>>, %arg3: memref<512x256xbf16, #tpu.memory_space<vmem>>, %arg4: memref<1x512xf32, #tpu.memory_space<vmem>>, %arg5: memref<1x512xf32, #tpu.memory_space<vmem>>, %arg6: memref<8x256xbf16, #tpu.memory_space<vmem>>, %arg7: memref<1x1x256xf32, #tpu.memory_space<vmem>>, %arg8: memref<1x1x256xf32, #tpu.memory_space<vmem>>) attributes {dimension_semantics = [#tpu.dimension_semantics<parallel>], iteration_bounds = array<i64: 1>, scalar_prefetch = 0 : i64, scratch_operands = 0 : i64, tpu.core_type = #tpu.core_type<tc>, window_params = [{transform_indices = @transform_0, window_bounds = array<i64: 8, 64>}, {pipeline_mode = #tpu.pipeline_mode<synchronous>, transform_indices = @transform_1, window_bounds = array<i64: 64, 512>}, {pipeline_mode = #tpu.pipeline_mode<synchronous>, transform_indices = @transform_2, window_bounds = array<i64: 512, 256>}, {pipeline_mode = #tpu.pipeline_mode<synchronous>, transform_indices = @transform_3, window_bounds = array<i64: 1, 512>}, {pipeline_mode = #tpu.pipeline_mode<synchronous>, transform_indices = @transform_4, window_bounds = array<i64: 1, 512>}, {transform_indices = @transform_5, window_bounds = array<i64: 8, 256>}, {transform_indices = @transform_6, window_bounds = array<i64: 1, 1, 256>}, {transform_indices = @transform_7, window_bounds = array<i64: 1, 1, 256>}]} {
    %c0 = arith.constant 0 : index
    %c0_0 = arith.constant 0 : index
    %0 = vector.load %arg1[%c0, %c0_0] : memref<8x64xf32, #tpu.memory_space<vmem>>, vector<8x64xf32>
    %1 = arith.truncf %0 : vector<8x64xf32> to vector<8x64xbf16>
    %c0_1 = arith.constant 0 : index
    %c0_2 = arith.constant 0 : index
    %2 = vector.load %arg2[%c0_1, %c0_2] : memref<64x512xbf16, #tpu.memory_space<vmem>>, vector<64x512xbf16>
    %cst = arith.constant dense<0.000000e+00> : vector<8x512xf32>
    %3 = tpu.matmul %1, %2, %cst {dimension_numbers = #tpu.dot_dimension_numbers<[1], [0], [0], [1], [0, 0, 1, 1], [], []>} : vector<8x64xbf16>, vector<64x512xbf16>, vector<8x512xf32> -> vector<8x512xf32>
    %c0_3 = arith.constant 0 : index
    %c0_4 = arith.constant 0 : index
    %4 = vector.load %arg4[%c0_3, %c0_4] : memref<1x512xf32, #tpu.memory_space<vmem>>, vector<1x512xf32>
    %5 = vector.broadcast %4 : vector<1x512xf32> to vector<8x512xf32>
    %6 = arith.mulf %3, %5 : vector<8x512xf32>
    %c0_5 = arith.constant 0 : index
    %c0_6 = arith.constant 0 : index
    %7 = vector.load %arg5[%c0_5, %c0_6] : memref<1x512xf32, #tpu.memory_space<vmem>>, vector<1x512xf32>
    %8 = vector.broadcast %7 : vector<1x512xf32> to vector<8x512xf32>
    %9 = arith.addf %6, %8 : vector<8x512xf32>
    %cst_7 = arith.constant 0.000000e+00 : f32
    %10 = vector.broadcast %cst_7 : f32 to vector<8x512xf32>
    %11 = arith.maximumf %9, %10 : vector<8x512xf32>
    %12 = arith.truncf %11 : vector<8x512xf32> to vector<8x512xbf16>
    %c0_8 = arith.constant 0 : index
    %c0_9 = arith.constant 0 : index
    %13 = vector.load %arg3[%c0_8, %c0_9] : memref<512x256xbf16, #tpu.memory_space<vmem>>, vector<512x256xbf16>
    %cst_10 = arith.constant dense<0.000000e+00> : vector<8x256xf32>
    %14 = tpu.matmul %12, %13, %cst_10 {dimension_numbers = #tpu.dot_dimension_numbers<[1], [0], [0], [1], [0, 0, 1, 1], [], []>} : vector<8x512xbf16>, vector<512x256xbf16>, vector<8x256xf32> -> vector<8x256xf32>
    %15 = arith.truncf %14 : vector<8x256xf32> to vector<8x256xbf16>
    %c0_11 = arith.constant 0 : index
    %c0_12 = arith.constant 0 : index
    %16 = vector.load %arg6[%c0_11, %c0_12] : memref<8x256xbf16, #tpu.memory_space<vmem>>, vector<8x256xbf16>
    tpu.vector_store %arg6[%c0_11, %c0_12], %15 {strides = array<i32>} : memref<8x256xbf16, #tpu.memory_space<vmem>>, vector<8x256xbf16>,
    %cst_13 = arith.constant dense<0.000000e+00> : vector<256xf32>
    %17 = vector.multi_reduction <add>, %14, %cst_13 [0] : vector<8x256xf32> to vector<256xf32>
    %18 = vector.shape_cast %17 : vector<256xf32> to vector<1x256xf32>
    %19 = vector.shape_cast %18 : vector<1x256xf32> to vector<1x1x256xf32>
    %c0_14 = arith.constant 0 : index
    %c0_15 = arith.constant 0 : index
    %c0_16 = arith.constant 0 : index
    %20 = vector.load %arg7[%c0_14, %c0_15, %c0_16] : memref<1x1x256xf32, #tpu.memory_space<vmem>>, vector<1x1x256xf32>
    tpu.vector_store %arg7[%c0_14, %c0_15, %c0_16], %19 {strides = array<i32>} : memref<1x1x256xf32, #tpu.memory_space<vmem>>, vector<1x1x256xf32>,
    %21 = arith.mulf %14, %14 : vector<8x256xf32>
    %cst_17 = arith.constant dense<0.000000e+00> : vector<256xf32>
    %22 = vector.multi_reduction <add>, %21, %cst_17 [0] : vector<8x256xf32> to vector<256xf32>
    %23 = vector.shape_cast %22 : vector<256xf32> to vector<1x256xf32>
    %24 = vector.shape_cast %23 : vector<1x256xf32> to vector<1x1x256xf32>
    %c0_18 = arith.constant 0 : index
    %c0_19 = arith.constant 0 : index
    %c0_20 = arith.constant 0 : index
    %25 = vector.load %arg8[%c0_18, %c0_19, %c0_20] : memref<1x1x256xf32, #tpu.memory_space<vmem>>, vector<1x1x256xf32>
    tpu.vector_store %arg8[%c0_18, %c0_19, %c0_20], %24 {strides = array<i32>} : memref<1x1x256xf32, #tpu.memory_space<vmem>>, vector<1x1x256xf32>,
    return
  }
  func.func @transform_0(%arg0: i32) -> (i32, i32) {
    %c0_i32 = arith.constant 0 : i32
    %c0_i32_0 = arith.constant 0 : i32
    return %arg0, %c0_i32 : i32, i32
  }
  func.func @transform_1(%arg0: i32) -> (i32, i32) {
    %c0_i32 = arith.constant 0 : i32
    %c0_i32_0 = arith.constant 0 : i32
    %c0_i32_1 = arith.constant 0 : i32
    return %c0_i32, %c0_i32_0 : i32, i32
  }
  func.func @transform_2(%arg0: i32) -> (i32, i32) {
    %c0_i32 = arith.constant 0 : i32
    %c0_i32_0 = arith.constant 0 : i32
    %c0_i32_1 = arith.constant 0 : i32
    return %c0_i32, %c0_i32_0 : i32, i32
  }
  func.func @transform_3(%arg0: i32) -> (i32, i32) {
    %c0_i32 = arith.constant 0 : i32
    %c0_i32_0 = arith.constant 0 : i32
    %c0_i32_1 = arith.constant 0 : i32
    return %c0_i32, %c0_i32_0 : i32, i32
  }
  func.func @transform_4(%arg0: i32) -> (i32, i32) {
    %c0_i32 = arith.constant 0 : i32
    %c0_i32_0 = arith.constant 0 : i32
    %c0_i32_1 = arith.constant 0 : i32
    return %c0_i32, %c0_i32_0 : i32, i32
  }
  func.func @transform_5(%arg0: i32) -> (i32, i32) {
    %c0_i32 = arith.constant 0 : i32
    %c0_i32_0 = arith.constant 0 : i32
    return %arg0, %c0_i32 : i32, i32
  }
  func.func @transform_6(%arg0: i32) -> (i32, i32, i32) {
    %c0_i32 = arith.constant 0 : i32
    %c0_i32_0 = arith.constant 0 : i32
    %c0_i32_1 = arith.constant 0 : i32
    return %arg0, %c0_i32, %c0_i32_0 : i32, i32, i32
  }
  func.func @transform_7(%arg0: i32) -> (i32, i32, i32) {
    %c0_i32 = arith.constant 0 : i32
    %c0_i32_0 = arith.constant 0 : i32
    %c0_i32_1 = arith.constant 0 : i32
    return %arg0, %c0_i32, %c0_i32_0 : i32, i32, i32
  }
}

module attributes {stable_mosaic.version = 11 : i64} {
  func.func @_bn2_relu_head_kernel(%arg0: i32, %arg1: memref<8x256xbf16, #tpu.memory_space<vmem>>, %arg2: memref<256x8xbf16, #tpu.memory_space<vmem>>, %arg3: memref<1x8xf32, #tpu.memory_space<vmem>>, %arg4: memref<1x256xf32, #tpu.memory_space<vmem>>, %arg5: memref<1x256xf32, #tpu.memory_space<vmem>>, %arg6: memref<8x8xf32, #tpu.memory_space<vmem>>) attributes {dimension_semantics = [#tpu.dimension_semantics<parallel>], iteration_bounds = array<i64: 1>, scalar_prefetch = 0 : i64, scratch_operands = 0 : i64, tpu.core_type = #tpu.core_type<tc>, window_params = [{transform_indices = @transform_0, window_bounds = array<i64: 8, 256>}, {pipeline_mode = #tpu.pipeline_mode<synchronous>, transform_indices = @transform_1, window_bounds = array<i64: 256, 8>}, {pipeline_mode = #tpu.pipeline_mode<synchronous>, transform_indices = @transform_2, window_bounds = array<i64: 1, 8>}, {pipeline_mode = #tpu.pipeline_mode<synchronous>, transform_indices = @transform_3, window_bounds = array<i64: 1, 256>}, {pipeline_mode = #tpu.pipeline_mode<synchronous>, transform_indices = @transform_4, window_bounds = array<i64: 1, 256>}, {transform_indices = @transform_5, window_bounds = array<i64: 8, 8>}]} {
    %c0 = arith.constant 0 : index
    %c0_0 = arith.constant 0 : index
    %0 = vector.load %arg1[%c0, %c0_0] : memref<8x256xbf16, #tpu.memory_space<vmem>>, vector<8x256xbf16>
    %1 = arith.extf %0 : vector<8x256xbf16> to vector<8x256xf32>
    %c0_1 = arith.constant 0 : index
    %c0_2 = arith.constant 0 : index
    %2 = vector.load %arg4[%c0_1, %c0_2] : memref<1x256xf32, #tpu.memory_space<vmem>>, vector<1x256xf32>
    %3 = vector.broadcast %2 : vector<1x256xf32> to vector<8x256xf32>
    %4 = arith.mulf %1, %3 : vector<8x256xf32>
    %c0_3 = arith.constant 0 : index
    %c0_4 = arith.constant 0 : index
    %5 = vector.load %arg5[%c0_3, %c0_4] : memref<1x256xf32, #tpu.memory_space<vmem>>, vector<1x256xf32>
    %6 = vector.broadcast %5 : vector<1x256xf32> to vector<8x256xf32>
    %7 = arith.addf %4, %6 : vector<8x256xf32>
    %cst = arith.constant 0.000000e+00 : f32
    %8 = vector.broadcast %cst : f32 to vector<8x256xf32>
    %9 = arith.maximumf %7, %8 : vector<8x256xf32>
    %10 = arith.truncf %9 : vector<8x256xf32> to vector<8x256xbf16>
    %c0_5 = arith.constant 0 : index
    %c0_6 = arith.constant 0 : index
    %11 = vector.load %arg2[%c0_5, %c0_6] : memref<256x8xbf16, #tpu.memory_space<vmem>>, vector<256x8xbf16>
    %cst_7 = arith.constant dense<0.000000e+00> : vector<8x8xf32>
    %12 = tpu.matmul %10, %11, %cst_7 {dimension_numbers = #tpu.dot_dimension_numbers<[1], [0], [0], [1], [0, 0, 1, 1], [], []>} : vector<8x256xbf16>, vector<256x8xbf16>, vector<8x8xf32> -> vector<8x8xf32>
    %c0_8 = arith.constant 0 : index
    %c0_9 = arith.constant 0 : index
    %13 = vector.load %arg3[%c0_8, %c0_9] : memref<1x8xf32, #tpu.memory_space<vmem>>, vector<1x8xf32>
    %14 = vector.broadcast %13 : vector<1x8xf32> to vector<8x8xf32>
    %15 = arith.addf %12, %14 : vector<8x8xf32>
    %c0_10 = arith.constant 0 : index
    %c0_11 = arith.constant 0 : index
    %16 = vector.load %arg6[%c0_10, %c0_11] : memref<8x8xf32, #tpu.memory_space<vmem>>, vector<8x8xf32>
    tpu.vector_store %arg6[%c0_10, %c0_11], %15 {strides = array<i32>} : memref<8x8xf32, #tpu.memory_space<vmem>>, vector<8x8xf32>,
    return
  }
  func.func @transform_0(%arg0: i32) -> (i32, i32) {
    %c0_i32 = arith.constant 0 : i32
    %c0_i32_0 = arith.constant 0 : i32
    return %arg0, %c0_i32 : i32, i32
  }
  func.func @transform_1(%arg0: i32) -> (i32, i32) {
    %c0_i32 = arith.constant 0 : i32
    %c0_i32_0 = arith.constant 0 : i32
    %c0_i32_1 = arith.constant 0 : i32
    return %c0_i32, %c0_i32_0 : i32, i32
  }
  func.func @transform_2(%arg0: i32) -> (i32, i32) {
    %c0_i32 = arith.constant 0 : i32
    %c0_i32_0 = arith.constant 0 : i32
    %c0_i32_1 = arith.constant 0 : i32
    return %c0_i32, %c0_i32_0 : i32, i32
  }
  func.func @transform_3(%arg0: i32) -> (i32, i32) {
    %c0_i32 = arith.constant 0 : i32
    %c0_i32_0 = arith.constant 0 : i32
    %c0_i32_1 = arith.constant 0 : i32
    return %c0_i32, %c0_i32_0 : i32, i32
  }
  func.func @transform_4(%arg0: i32) -> (i32, i32) {
    %c0_i32 = arith.constant 0 : i32
    %c0_i32_0 = arith.constant 0 : i32
    %c0_i32_1 = arith.constant 0 : i32
    return %c0_i32, %c0_i32_0 : i32, i32
  }
  func.func @transform_5(%arg0: i32) -> (i32, i32) {
    %c0_i32 = arith.constant 0 : i32
    %c0_i32_0 = arith.constant 0 : i32
    return %arg0, %c0_i32 : i32, i32
  }
}

</mosaic_0001>

<bundles_post_ra>
// kernel: bbreg_net.3
= control target key start
LH: loop header
LB: loop body
LE: loop exit
PB: predicated region body
PF: predicated region fallthrough
CT: control target
= control target key end

     0   :  { %v26_v5 = vlaneseq  ;;  %vm231_vm0 = vcmask 64512   ;;  %s385_s1 = inlined_call_operand.vmem [shape: bf16[256,8], index: 1, kind: input, shape index: {}]   ;;  %s386_s0 = inlined_call_operand.vmem [shape: bf16[8,256], index: 0, kind: input, shape index: {}]   ;;  %s387_s3 = inlined_call_operand.vmem [shape: f32[1,256], index: 3, kind: input, shape index: {}]   ;;  %s388_s4 = inlined_call_operand.vmem [shape: f32[1,256], index: 4, kind: input, shape index: {}]   ;;  %s389_s2 = inlined_call_operand.vmem [shape: f32[1,8], index: 2, kind: input, shape index: {}]   ;;  %s390_s5 = inlined_call_operand.vmem [shape: f32[8,8], index: 5, kind: output, shape index: {}]  }
   0x1   :  { %v276_v0 = vld [vmem:[%s385_s1 + $0x40] sm:$0xff]   ;;  %v278_v2 = vld [vmem:[%s385_s1 + $0x48] sm:$0xff]   ;;  %v280_v4 = vld [vmem:[%s385_s1 + $0x50] sm:$0xff]  }
   0x2   :  { %v277_v1 = vld [vmem:[%s385_s1] sm:$0xff]   ;;  %254 = vmatprep.subr.bf16.mxu0 %v276_v0  ;;  %v279_v3 = vld [vmem:[%s385_s1 + $0x8] sm:$0xff]   ;;  %v281_v6 = vld [vmem:[%s385_s1 + $0x10] sm:$0xff]   ;;  %v27_v8 = vshrl.u32 %v26_v5, 7 }
   0x3   :  { %255 = vmatpush3.bf16.msra.mxu0 %v277_v1  ;;  %v282_v7 = vld [vmem:[%s385_s1 + $0x58] sm:$0xff]   ;;  %v284_v10 = vld [vmem:[%s385_s1 + $0x60] sm:$0xff]   ;;  %v286_v14 = vld [vmem:[%s385_s1 + $0x68] sm:$0xff]  }
   0x4   :  { %256 = vmatprep.subr.bf16.mxu0 %v278_v2  ;;  %v283_v9 = vld [vmem:[%s385_s1 + $0x18] sm:$0xff]   ;;  %v28_v11 = vsub.s32 0, %v27_v8  ;;  %v32_v12 = vsub.s32 1, %v27_v8  ;;  %v285_v13 = vld [vmem:[%s385_s1 + $0x20] sm:$0xff]   ;;  %v287_v24 = vld [vmem:[%s385_s1 + $0x28] sm:$0xff]  }
   0x5   :  { %v21_v15 = vld [vmem:[%s386_s0] sm:$0xff]  ;;  %v288_v27 = vld [vmem:[%s385_s1 + $0x70] sm:$0xff]   ;;  %v290_v32 = vld [vmem:[%s385_s1 + $0x78] sm:$0xff]  }
   0x6   :  { %v24_v16 = vld [vmem:[%s387_s3] sm:$0x3]  ;;  %v22_v18 = vunpack.c.l.bf16 %v21_v15  ;;  %v23_v19 = vunpack.c.h.bf16 %v21_v15  ;;  %v289_v30 = vld [vmem:[%s385_s1 + $0x30] sm:$0xff]   ;;  %v291_v35 = vld [vmem:[%s385_s1 + $0x38] sm:$0xff]  }
   0x7   :  { %257 = vmatpush3.bf16.msra.mxu0 %v279_v3  ;;  %v38_v17 = vld [vmem:[%s388_s4] sm:$0x3]  ;;  %v29_v20 = vrot.slane %v24_v16, %v28_v11  ;;  %v33_v21 = vrot.slane %v24_v16, %v32_v12 }
   0x8   :  { %258 = vmatprep.subr.bf16.mxu0 %v280_v4  ;;  %v43_v22 = vrot.slane %v38_v17, %v28_v11  ;;  %v47_v23 = vrot.slane %v38_v17, %v32_v12  ;;  %v237_v38 = vld [vmem:[%s389_s2] ss:$0 sm:$0xff] }
   0x9   :  { %v37_v25 = vmul.f32 %v33_v21, %v23_v19  ;;  %v36_v26 = vmul.f32 %v29_v20, %v22_v18 }
   0xb   :  { %259 = vmatpush3.bf16.msra.mxu0 %v281_v6  ;;  %v51_v28 = vadd.f32 %v47_v23, %v37_v25  ;;  %v50_v29 = vadd.f32 %v43_v22, %v36_v26 }
   0xc   :  { %260 = vmatprep.subr.bf16.mxu0 %v282_v7 }
   0xd   :  { %v53_v31 = vmax.f32 %v51_v28, 0.0  ;;  %v52_v34 = vmax.f32 %v50_v29, 0.0 }
   0xf   :  { %261 = vmatpush3.bf16.msra.mxu0 %v283_v9  ;;  %v55_v33 = vpack.c.bf16 %v53_v31, %v53_v31  ;;  %v54_v36 = vpack.c.bf16 %v52_v34, %v52_v34 }
  0x10   :  { %262 = vmatprep.subr.bf16.mxu0 %v284_v10 }
  0x11   :  { %223 = vmatprep.mubr.bf16.mxu0 %v55_v33 }
  0x13   :  { %263 = vmatpush3.bf16.msra.mxu0 %v285_v13 }
  0x14   :  { %264 = vmatprep.subr.bf16.mxu0 %v286_v14 }
  0x17   :  { %265 = vmatpush3.bf16.msra.mxu0 %v287_v24 }
  0x18   :  { %266 = vmatprep.subr.bf16.mxu0 %v288_v27 }
  0x1b   :  { %267 = vmatpush3.bf16.msra.mxu0 %v289_v30 }
  0x1c   :  { %268 = vmatprep.subr.bf16.mxu0 %v290_v32 }
  0x1f   :  { %269 = vmatpush3.bf16.msra.mxu0 %v291_v35 }
  0x22   :  { %224 = vmatmul.mubr.bf16.vlgmr.msra.gmra.mrb[0].mxu0 %v54_v36 }
  0xf5   :  { %v270_v37 = vpop.f32.mrb[0].mxu0 }
  0xf6   :  { %v271_v39 = vpop.f32.mrb[1].mxu0 }
  0xf7   :  { %v272_v40 = vadd.f32 %v271_v39, %v270_v37  ;;  %v273_v41 = vpop.f32.mrb[2].mxu0 }
  0xf8   :  { %v274_v42 = vpop.f32.mrb[3].mxu0 }
  0xf9   :  { %v226_v43 = vadd.f32 %v272_v40, %v237_v38 }
  0xfb   :  { %232 = vst.msk [vmem:[%s390_s5] sm:$0xff] %vm231_vm0, %v226_v43 }

// kernel: bbreg_net.2
= control target key start
LH: loop header
LB: loop body
LE: loop exit
PB: predicated region body
PF: predicated region fallthrough
CT: control target
= control target key end

     0   :  { %v1031_v1 = vmov 0   ;;  %vm122_vm0 = vcmask 523264   ;;  %s1340_s1 = inlined_call_operand.vmem [shape: bf16[64,512], index: 1, kind: input, shape index: {}]   ;;  %s1341_s0 = inlined_call_operand.vmem [shape: f32[8,64], index: 0, kind: input, shape index: {}]   ;;  %s1342_s2 = inlined_call_operand.vmem [shape: bf16[512,256], index: 2, kind: input, shape index: {}]   ;;  %s1343_s3 = inlined_call_operand.vmem [shape: f32[1,512], index: 3, kind: input, shape index: {}]   ;;  %s1344_s4 = inlined_call_operand.vmem [shape: f32[1,512], index: 4, kind: input, shape index: {}]   ;;  %s1345_s5 = inlined_call_operand.vmem [shape: bf16[8,256], index: 5, kind: output, shape index: {0}]   ;;  %s1346_s6 = inlined_call_operand.vmem [shape: f32[1,1,256], index: 6, kind: output, shape index: {1}]   ;;  %s1347_s7 = inlined_call_operand.vmem [shape: f32[1,1,256], index: 7, kind: output, shape index: {2}]  }
   0x1   :  { %v911_v0 = vld [vmem:[%s1340_s1 + $0x4] ss:$16 sps:$4 sm:$0xff]   ;;  %158 = vmatprep.mubr.bf16.mxu0 %v1031_v1  ;;  %199 = vmatprep.mubr.bf16.mxu1 %v1031_v1  ;;  %v913_v2 = vld [vmem:[%s1340_s1 + $0xc] ss:$16 sps:$4 sm:$0xff]   ;;  %v915_v3 = vld [vmem:[%s1340_s1] ss:$16 sps:$4 sm:$0xff]  }
   0x2   :  { %126 = vmatprep.subr.bf16.mxu0 %v911_v0  ;;  %v916_v4 = vld [vmem:[%s1340_s1 + $0x8] ss:$16 sps:$4 sm:$0xff]   ;;  %167 = vmatprep.subr.bf16.mxu1 %v913_v2  ;;  %v917_v5 = vld [vmem:[%s1340_s1 + $0x24] ss:$16 sps:$4 sm:$0xff]   ;;  %v919_v6 = vld [vmem:[%s1340_s1 + $0x2c] ss:$16 sps:$4 sm:$0xff]  }
   0x3   :  { %127 = vmatpush1.bf16.msra.mxu0 %v915_v3  ;;  %168 = vmatpush1.bf16.msra.mxu1 %v916_v4  ;;  %v921_v7 = vld [vmem:[%s1340_s1 + $0x20] ss:$16 sps:$4 sm:$0xff]   ;;  %v922_v8 = vld [vmem:[%s1340_s1 + $0x28] ss:$16 sps:$4 sm:$0xff]   ;;  %v923_v9 = vld [vmem:[%s1340_s1 + $0x44] ss:$16 sps:$4 sm:$0xff]  }
   0x4   :  { %128 = vmatprep.subr.bf16.mxu0 %v917_v5  ;;  %169 = vmatprep.subr.bf16.mxu1 %v919_v6  ;;  %v925_v10 = vld [vmem:[%s1340_s1 + $0x4c] ss:$16 sps:$4 sm:$0xff]   ;;  %v927_v11 = vld [vmem:[%s1340_s1 + $0x40] ss:$16 sps:$4 sm:$0xff]   ;;  %v928_v12 = vld [vmem:[%s1340_s1 + $0x48] ss:$16 sps:$4 sm:$0xff]  }
   0x5   :  { %v929_v13 = vld [vmem:[%s1340_s1 + $0x64] ss:$16 sps:$4 sm:$0xff]   ;;  %v931_v14 = vld [vmem:[%s1340_s1 + $0x6c] ss:$16 sps:$4 sm:$0xff]   ;;  %v933_v15 = vld [vmem:[%s1340_s1 + $0x60] ss:$16 sps:$4 sm:$0xff]  }
   0x6   :  { %v934_v16 = vld [vmem:[%s1340_s1 + $0x68] ss:$16 sps:$4 sm:$0xff]   ;;  %v24_v17 = vld [vmem:[%s1341_s0] sm:$0xff]  ;;  %v943_v23 = vld [vmem:[%s1342_s2 + $0x14] ss:$8 sps:$4 sm:$0xff]  }
   0x7   :  { %129 = vmatpush1.bf16.msra.mxu0 %v921_v7  ;;  %170 = vmatpush1.bf16.msra.mxu1 %v922_v8  ;;  %v937_v18 = vld [vmem:[%s1342_s2 + $0x4] ss:$8 sps:$4 sm:$0xff]   ;;  %v25_v20 = vpack.c.bf16 %v24_v17, %v24_v17  ;;  %v935_v21 = vld [vmem:[%s1342_s2] ss:$8 sps:$4 sm:$0xff]   ;;  %v946_v24 = vld [vmem:[%s1342_s2 + $0x114] ss:$8 sps:$4 sm:$0xff]  }
   0x8   :  { %130 = vmatprep.subr.bf16.mxu0 %v923_v9  ;;  %171 = vmatprep.subr.bf16.mxu1 %v925_v10  ;;  %v940_v19 = vld [vmem:[%s1342_s2 + $0x104] ss:$8 sps:$4 sm:$0xff]   ;;  %v938_v22 = vld [vmem:[%s1342_s2 + $0x100] ss:$8 sps:$4 sm:$0xff]   ;;  %v941_v25 = vld [vmem:[%s1342_s2 + $0x10] ss:$8 sps:$4 sm:$0xff]  }
   0x9   :  { %v944_v26 = vld [vmem:[%s1342_s2 + $0x110] ss:$8 sps:$4 sm:$0xff]   ;;  %v949_v27 = vld [vmem:[%s1342_s2 + $0x24] ss:$8 sps:$4 sm:$0xff]   ;;  %v947_v29 = vld [vmem:[%s1342_s2 + $0x20] ss:$8 sps:$4 sm:$0xff]  }
   0xa   :  { %v952_v28 = vld [vmem:[%s1342_s2 + $0x124] ss:$8 sps:$4 sm:$0xff]   ;;  %v950_v30 = vld [vmem:[%s1342_s2 + $0x120] ss:$8 sps:$4 sm:$0xff]   ;;  %v955_v31 = vld [vmem:[%s1342_s2 + $0x34] ss:$8 sps:$4 sm:$0xff]  }
   0xb   :  { %131 = vmatpush1.bf16.msra.mxu0 %v927_v11  ;;  %172 = vmatpush1.bf16.msra.mxu1 %v928_v12  ;;  %v958_v32 = vld [vmem:[%s1342_s2 + $0x134] ss:$8 sps:$4 sm:$0xff]   ;;  %v953_v33 = vld [vmem:[%s1342_s2 + $0x30] ss:$8 sps:$4 sm:$0xff]   ;;  %v961_v35 = vld [vmem:[%s1342_s2 + $0x44] ss:$8 sps:$4 sm:$0xff]  }
   0xc   :  { %132 = vmatprep.subr.bf16.mxu0 %v929_v13  ;;  %173 = vmatprep.subr.bf16.mxu1 %v931_v14  ;;  %v956_v34 = vld [vmem:[%s1342_s2 + $0x130] ss:$8 sps:$4 sm:$0xff]   ;;  %v964_v36 = vld [vmem:[%s1342_s2 + $0x144] ss:$8 sps:$4 sm:$0xff]   ;;  %v959_v37 = vld [vmem:[%s1342_s2 + $0x40] ss:$8 sps:$4 sm:$0xff]  }
   0xd   :  { %v962_v38 = vld [vmem:[%s1342_s2 + $0x140] ss:$8 sps:$4 sm:$0xff]   ;;  %v967_v39 = vld [vmem:[%s1342_s2 + $0x54] ss:$8 sps:$4 sm:$0xff]   ;;  %v965_v41 = vld [vmem:[%s1342_s2 + $0x50] ss:$8 sps:$4 sm:$0xff]  }
   0xe   :  { %v970_v40 = vld [vmem:[%s1342_s2 + $0x154] ss:$8 sps:$4 sm:$0xff]   ;;  %v968_v42 = vld [vmem:[%s1342_s2 + $0x150] ss:$8 sps:$4 sm:$0xff]   ;;  %v973_v43 = vld [vmem:[%s1342_s2 + $0x64] ss:$8 sps:$4 sm:$0xff]  }
   0xf   :  { %133 = vmatpush1.bf16.msra.mxu0 %v933_v15  ;;  %174 = vmatpush1.bf16.msra.mxu1 %v934_v16  ;;  %v976_v44 = vld [vmem:[%s1342_s2 + $0x164] ss:$8 sps:$4 sm:$0xff]   ;;  %v971_v45 = vld [vmem:[%s1342_s2 + $0x60] ss:$8 sps:$4 sm:$0xff]   ;;  %v979_v47 = vld [vmem:[%s1342_s2 + $0x74] ss:$8 sps:$4 sm:$0xff]  }
  0x10   :  { %652 = vmatprep.subr.bf16.mxu1 %v937_v18  ;;  %693 = vmatprep.subr.bf16.mxu0 %v940_v19  ;;  %v974_v46 = vld [vmem:[%s1342_s2 + $0x160] ss:$8 sps:$4 sm:$0xff]   ;;  %v982_v48 = vld [vmem:[%s1342_s2 + $0x174] ss:$8 sps:$4 sm:$0xff]   ;;  %v977_v49 = vld [vmem:[%s1342_s2 + $0x70] ss:$8 sps:$4 sm:$0xff]   ;;  %v210_v19 = vlaneseq }
  0x11   :  { %v980_v50 = vld [vmem:[%s1342_s2 + $0x170] ss:$8 sps:$4 sm:$0xff]   ;;  %v985_v51 = vld [vmem:[%s1342_s2 + $0x84] ss:$8 sps:$4 sm:$0xff]   ;;  %v983_v53 = vld [vmem:[%s1342_s2 + $0x80] ss:$8 sps:$4 sm:$0xff]  }
  0x12   :  { %839 = vmatmul.mubr.msk.bf16.vlgmr.msra.gmra.mrb[0].mxu0 %vm122_vm0, %v25_v20  ;;  %840 = vmatmul.mubr.msk.bf16.vlgmr.msra.gmra.mrb[0].mxu1 %vm122_vm0, %v25_v20  ;;  %v988_v52 = vld [vmem:[%s1342_s2 + $0x184] ss:$8 sps:$4 sm:$0xff]   ;;  %v986_v54 = vld [vmem:[%s1342_s2 + $0x180] ss:$8 sps:$4 sm:$0xff]   ;;  %v991_v55 = vld [vmem:[%s1342_s2 + $0x94] ss:$8 sps:$4 sm:$0xff]  }
  0x13   :  { %653 = vmatpush1.bf16.msra.mxu1 %v935_v21  ;;  %694 = vmatpush1.bf16.msra.mxu0 %v938_v22  ;;  %v994_v56 = vld [vmem:[%s1342_s2 + $0x194] ss:$8 sps:$4 sm:$0xff]   ;;  %v989_v57 = vld [vmem:[%s1342_s2 + $0x90] ss:$8 sps:$4 sm:$0xff]   ;;  %v997_v59 = vld [vmem:[%s1342_s2 + $0xa4] ss:$8 sps:$4 sm:$0xff]  }
  0x14   :  { %654 = vmatprep.subr.bf16.mxu1 %v943_v23  ;;  %695 = vmatprep.subr.bf16.mxu0 %v946_v24  ;;  %v992_v58 = vld [vmem:[%s1342_s2 + $0x190] ss:$8 sps:$4 sm:$0xff]   ;;  %v1000_v60 = vld [vmem:[%s1342_s2 + $0x1a4] ss:$8 sps:$4 sm:$0xff]   ;;  %v995_v61 = vld [vmem:[%s1342_s2 + $0xa0] ss:$8 sps:$4 sm:$0xff]  }
  0x15   :  { %v998_v62 = vld [vmem:[%s1342_s2 + $0x1a0] ss:$8 sps:$4 sm:$0xff]   ;;  %v1003_v63 = vld [vmem:[%s1342_s2 + $0xb4] ss:$8 sps:$4 sm:$0xff]   ;;  %v1001_v1 = vld [vmem:[%s1342_s2 + $0xb0] ss:$8 sps:$4 sm:$0xff]  }
  0x16   :  { %v1006_v0 = vld [vmem:[%s1342_s2 + $0x1b4] ss:$8 sps:$4 sm:$0xff]   ;;  %v1004_v2 = vld [vmem:[%s1342_s2 + $0x1b0] ss:$8 sps:$4 sm:$0xff]   ;;  %v1009_v3 = vld [vmem:[%s1342_s2 + $0xc4] ss:$8 sps:$4 sm:$0xff]  }
  0x17   :  { %655 = vmatpush1.bf16.msra.mxu1 %v941_v25  ;;  %696 = vmatpush1.bf16.msra.mxu0 %v944_v26  ;;  %v1012_v4 = vld [vmem:[%s1342_s2 + $0x1c4] ss:$8 sps:$4 sm:$0xff]   ;;  %v1007_v5 = vld [vmem:[%s1342_s2 + $0xc0] ss:$8 sps:$4 sm:$0xff]   ;;  %v1015_v7 = vld [vmem:[%s1342_s2 + $0xd4] ss:$8 sps:$4 sm:$0xff]  }
  0x18   :  { %656 = vmatprep.subr.bf16.mxu1 %v949_v27  ;;  %697 = vmatprep.subr.bf16.mxu0 %v952_v28  ;;  %v1010_v6 = vld [vmem:[%s1342_s2 + $0x1c0] ss:$8 sps:$4 sm:$0xff]   ;;  %v1018_v8 = vld [vmem:[%s1342_s2 + $0x1d4] ss:$8 sps:$4 sm:$0xff]   ;;  %v1013_v9 = vld [vmem:[%s1342_s2 + $0xd0] ss:$8 sps:$4 sm:$0xff]  }
  0x19   :  { %v1016_v10 = vld [vmem:[%s1342_s2 + $0x1d0] ss:$8 sps:$4 sm:$0xff]   ;;  %v1021_v11 = vld [vmem:[%s1342_s2 + $0xe4] ss:$8 sps:$4 sm:$0xff]   ;;  %v1019_v13 = vld [vmem:[%s1342_s2 + $0xe0] ss:$8 sps:$4 sm:$0xff]  }
  0x1a   :  { %v1024_v12 = vld [vmem:[%s1342_s2 + $0x1e4] ss:$8 sps:$4 sm:$0xff]   ;;  %v1022_v14 = vld [vmem:[%s1342_s2 + $0x1e0] ss:$8 sps:$4 sm:$0xff]   ;;  %v1027_v15 = vld [vmem:[%s1342_s2 + $0xf4] ss:$8 sps:$4 sm:$0xff]  }
  0x1b   :  { %657 = vmatpush1.bf16.msra.mxu1 %v947_v29  ;;  %698 = vmatpush1.bf16.msra.mxu0 %v950_v30  ;;  %v1030_v16 = vld [vmem:[%s1342_s2 + $0x1f4] ss:$8 sps:$4 sm:$0xff]   ;;  %v1025_v17 = vld [vmem:[%s1342_s2 + $0xf0] ss:$8 sps:$4 sm:$0xff]   ;;  %v1317_v20 = vshrl.u32 %v210_v19, 7  ;;  %vm775_vm1 = vcmp.lt.s32.totalorder %v210_v19, 256 }
  0x1c   :  { %658 = vmatprep.subr.bf16.mxu1 %v955_v31  ;;  %699 = vmatprep.subr.bf16.mxu0 %v958_v32  ;;  %v1028_v18 = vld [vmem:[%s1342_s2 + $0x1f0] ss:$8 sps:$4 sm:$0xff]   ;;  %v208_v23 = vld [vmem:[%s1343_s3] sm:$0xf] }
  0x1d   :  { %v212_v21 = vsub.s32 0, %v1317_v20  ;;  %v220_v22 = vsub.s32 2, %v1317_v20  ;;  %v216_v24 = vsub.s32 1, %v1317_v20  ;;  %v224_v25 = vsub.s32 3, %v1317_v20  ;;  %v234_v26 = vld [vmem:[%s1344_s4] sm:$0xf] }
  0x1f   :  { %659 = vmatpush1.bf16.msra.mxu1 %v953_v33  ;;  %700 = vmatpush1.bf16.msra.mxu0 %v956_v34  ;;  %v213_v27 = vrot.slane %v208_v23, %v212_v21  ;;  %v221_v28 = vrot.slane %v208_v23, %v220_v22  ;;  %v217_v29 = vrot.slane %v208_v23, %v216_v24 }
  0x20   :  { %660 = vmatprep.subr.bf16.mxu1 %v961_v35  ;;  %701 = vmatprep.subr.bf16.mxu0 %v964_v36  ;;  %v225_v30 = vrot.slane %v208_v23, %v224_v25  ;;  %v239_v31 = vrot.slane %v234_v26, %v212_v21  ;;  %v247_v32 = vrot.slane %v234_v26, %v220_v22 }
  0x21   :  { %v243_v35 = vrot.slane %v234_v26, %v216_v24  ;;  %v251_v36 = vrot.slane %v234_v26, %v224_v25 }
  0x23   :  { %661 = vmatpush1.bf16.msra.mxu1 %v959_v37  ;;  %702 = vmatpush1.bf16.msra.mxu0 %v962_v38 }
  0x24   :  { %662 = vmatprep.subr.bf16.mxu1 %v967_v39  ;;  %703 = vmatprep.subr.bf16.mxu0 %v970_v40 }
  0x27   :  { %663 = vmatpush1.bf16.msra.mxu1 %v965_v41  ;;  %704 = vmatpush1.bf16.msra.mxu0 %v968_v42 }
  0x28   :  { %664 = vmatprep.subr.bf16.mxu1 %v973_v43  ;;  %705 = vmatprep.subr.bf16.mxu0 %v976_v44 }
  0x2b   :  { %665 = vmatpush1.bf16.msra.mxu1 %v971_v45  ;;  %706 = vmatpush1.bf16.msra.mxu0 %v974_v46 }
  0x2c   :  { %666 = vmatprep.subr.bf16.mxu1 %v979_v47  ;;  %707 = vmatprep.subr.bf16.mxu0 %v982_v48 }
  0x2f   :  { %667 = vmatpush1.bf16.msra.mxu1 %v977_v49  ;;  %708 = vmatpush1.bf16.msra.mxu0 %v980_v50 }
  0x30   :  { %668 = vmatprep.subr.bf16.mxu1 %v985_v51  ;;  %709 = vmatprep.subr.bf16.mxu0 %v988_v52 }
  0x33   :  { %669 = vmatpush1.bf16.msra.mxu1 %v983_v53  ;;  %710 = vmatpush1.bf16.msra.mxu0 %v986_v54 }
  0x34   :  { %670 = vmatprep.subr.bf16.mxu1 %v991_v55  ;;  %711 = vmatprep.subr.bf16.mxu0 %v994_v56 }
  0x37   :  { %671 = vmatpush1.bf16.msra.mxu1 %v989_v57  ;;  %712 = vmatpush1.bf16.msra.mxu0 %v992_v58 }
  0x38   :  { %672 = vmatprep.subr.bf16.mxu1 %v997_v59  ;;  %713 = vmatprep.subr.bf16.mxu0 %v1000_v60 }
  0x3b   :  { %673 = vmatpush1.bf16.msra.mxu1 %v995_v61  ;;  %714 = vmatpush1.bf16.msra.mxu0 %v998_v62 }
  0x3c   :  { %674 = vmatprep.subr.bf16.mxu1 %v1003_v63  ;;  %715 = vmatprep.subr.bf16.mxu0 %v1006_v0 }
  0x3f   :  { %675 = vmatpush1.bf16.msra.mxu1 %v1001_v1  ;;  %716 = vmatpush1.bf16.msra.mxu0 %v1004_v2 }
  0x40   :  { %676 = vmatprep.subr.bf16.mxu1 %v1009_v3  ;;  %717 = vmatprep.subr.bf16.mxu0 %v1012_v4 }
  0x43   :  { %677 = vmatpush1.bf16.msra.mxu1 %v1007_v5  ;;  %718 = vmatpush1.bf16.msra.mxu0 %v1010_v6 }
  0x44   :  { %678 = vmatprep.subr.bf16.mxu1 %v1015_v7  ;;  %719 = vmatprep.subr.bf16.mxu0 %v1018_v8 }
  0x47   :  { %679 = vmatpush1.bf16.msra.mxu1 %v1013_v9  ;;  %720 = vmatpush1.bf16.msra.mxu0 %v1016_v10 }
  0x48   :  { %680 = vmatprep.subr.bf16.mxu1 %v1021_v11  ;;  %721 = vmatprep.subr.bf16.mxu0 %v1024_v12 }
  0x4b   :  { %681 = vmatpush1.bf16.msra.mxu1 %v1019_v13  ;;  %722 = vmatpush1.bf16.msra.mxu0 %v1022_v14  ;;  %v1032_v13 = vmov 1966171168  }
  0x4c   :  { %682 = vmatprep.subr.bf16.mxu1 %v1027_v15  ;;  %723 = vmatprep.subr.bf16.mxu0 %v1030_v16  ;;  %v759_v14 = vunpack.c.l.s4 %v1032_v13 }
  0x4e   :  { %v760_v25 = vunpack.c.0.s8 %v759_v14 }
  0x4f   :  { %683 = vmatpush1.bf16.msra.mxu1 %v1025_v17  ;;  %724 = vmatpush1.bf16.msra.mxu0 %v1028_v18 }
  0xe5   :  { %v160_v33 = vpop.f32.mrb[0].mxu0  ;;  %v201_v34 = vpop.f32.mrb[0].mxu1 }
  0xe6   :  { %v230_v37 = vmul.f32 %v213_v27, %v160_v33  ;;  %v232_v38 = vmul.f32 %v221_v28, %v201_v34  ;;  %v162_v39 = vpop.f32.mrb[1].mxu0  ;;  %v203_v40 = vpop.f32.mrb[1].mxu1  ;;  %v763_v34 = vsub.s32 %v760_v25, %v1317_v20 }
  0xe7   :  { %v231_v41 = vmul.f32 %v217_v29, %v162_v39  ;;  %v233_v42 = vmul.f32 %v225_v30, %v203_v40  ;;  %v164_v43 = vpop.f32.mrb[2].mxu0  ;;  %v205_v44 = vpop.f32.mrb[2].mxu1 }
  0xe8   :  { %v256_v45 = vadd.f32 %v239_v31, %v230_v37  ;;  %v258_v46 = vadd.f32 %v247_v32, %v232_v38  ;;  %v165_v47 = vpop.f32.mrb[3].mxu0  ;;  %v206_v48 = vpop.f32.mrb[3].mxu1 }
  0xe9   :  { %v257_v49 = vadd.f32 %v243_v35, %v231_v41  ;;  %v259_v50 = vadd.f32 %v251_v36, %v233_v42 }
  0xea   :  { %v260_v51 = vmax.f32 %v256_v45, 0.0  ;;  %v262_v52 = vmax.f32 %v258_v46, 0.0 }
  0xeb   :  { %v261_v53 = vmax.f32 %v257_v49, 0.0  ;;  %v263_v54 = vmax.f32 %v259_v50, 0.0 }
  0xec   :  { %v264_v57 = vpack.c.bf16 %v260_v51, %v260_v51  ;;  %v266_v58 = vpack.c.bf16 %v262_v52, %v262_v52 }
  0xed   :  { %v265_v55 = vpack.c.bf16 %v261_v53, %v261_v53  ;;  %v267_v56 = vpack.c.bf16 %v263_v54, %v263_v54 }
  0xef   :  { %684 = vmatprep.mubr.bf16.mxu1 %v265_v55  ;;  %725 = vmatprep.mubr.bf16.mxu0 %v267_v56 }
  0xf0   :  { %685 = vmatmul.mubr.bf16.vlgmr.msra.gmra.mrb[4].mxu1 %v264_v57  ;;  %726 = vmatmul.mubr.bf16.vlgmr.msra.gmra.mrb[4].mxu0 %v266_v58 }
 0x1c3   :  { %v686_v59 = vpop.f32.mrb[4].mxu1  ;;  %v727_v60 = vpop.f32.mrb[4].mxu0 }
 0x1c4   :  { %v728_v61 = vadd.f32 %v727_v60, %v686_v59  ;;  %v688_v62 = vpop.f32.mrb[5].mxu1  ;;  %v729_v63 = vpop.f32.mrb[5].mxu0 }
 0x1c5   :  { %v730_v0 = vadd.f32 %v729_v63, %v688_v62  ;;  %v690_v1 = vpop.f32.mrb[6].mxu1  ;;  %v731_v2 = vpop.f32.mrb[6].mxu0 }
 0x1c6   :  { %v743_v3 = vrot.slane %v728_v61, 4  ;;  %v778_v4 = vmul.f32 %v728_v61, %v728_v61  ;;  %v691_v5 = vpop.f32.mrb[7].mxu1  ;;  %v732_v6 = vpop.f32.mrb[7].mxu0 }
 0x1c7   :  { %v906_v7 = vpack.c.bf16 %v730_v0, %v728_v61  ;;  %v749_v8 = vrot.slane %v730_v0, 4  ;;  %v779_v9 = vmul.f32 %v730_v0, %v730_v0 }
 0x1c8   :  { %v744_v10 = vadd.f32 %v743_v3, %v728_v61  ;;  %v780_v11 = vrot.slane %v778_v4, 4 }
 0x1c9   :  { %742 = vst [vmem:[%s1345_s5] sm:$0xff] %v906_v7  ;;  %v750_v12 = vadd.f32 %v749_v8, %v730_v0  ;;  %v786_v15 = vrot.slane %v779_v9, 4 }
 0x1ca   :  { %v745_v16 = vrot.slane %v744_v10, 2  ;;  %v781_v17 = vadd.f32 %v780_v11, %v778_v4 }
 0x1cb   :  { %v751_v18 = vrot.slane %v750_v12, 2  ;;  %v787_v21 = vadd.f32 %v786_v15, %v779_v9 }
 0x1cc   :  { %v746_v22 = vadd.f32 %v745_v16, %v744_v10  ;;  %v782_v23 = vrot.slane %v781_v17, 2 }
 0x1cd   :  { %v752_v24 = vadd.f32 %v751_v18, %v750_v12  ;;  %v788_v26 = vrot.slane %v787_v21, 2 }
 0x1ce   :  { %v747_v27 = vrot.slane %v746_v22, 1  ;;  %v783_v28 = vadd.f32 %v782_v23, %v781_v17 }
 0x1cf   :  { %v753_v29 = vrot.slane %v752_v24, 1  ;;  %v789_v30 = vadd.f32 %v788_v26, %v787_v21 }
 0x1d0   :  { %v748_v31 = vadd.f32 %v747_v27, %v746_v22  ;;  %v784_v32 = vrot.slane %v783_v28, 1 }
 0x1d1   :  { %v754_v33 = vadd.f32 %v753_v29, %v752_v24  ;;  %v790_v35 = vrot.slane %v789_v30, 1 }
 0x1d2   :  { %v785_v36 = vadd.f32 %v784_v32, %v783_v28 }
 0x1d3   :  { %v757_v37 = vcombine.low %v748_v31, %v754_v33  ;;  %v791_v38 = vadd.f32 %v790_v35, %v789_v30 }
 0x1d5   :  { %v764_v39 = vrot.slane %v757_v37, %v763_v34  ;;  %v794_v40 = vcombine.low %v785_v36, %v791_v38 }
 0x1d7   :  { %v771_v41 = vrot.slane %v764_v39, %v763_v34  ;;  %v801_v42 = vrot.slane %v794_v40, %v763_v34 }
 0x1d9   :  { %777 = vst.msk [vmem:[%s1346_s6] sm:$0x3] %vm775_vm1, %v771_v41  ;;  %v808_v43 = vrot.slane %v801_v42, %v763_v34 }
 0x1db   :  { %810 = vst.msk [vmem:[%s1347_s7] sm:$0x3] %vm775_vm1, %v808_v43 }

</bundles_post_ra>
